<compile_context>
chip_gen: v7x
topology: tpu7x:2x2x1
jax: 0.10.0
libtpu: 0.0.40
codegen_flags: <defaults>
</compile_context>

<pallas_src>
import functools

import jax
import jax.numpy as jnp
from jax.experimental import pallas as pl
from jax.experimental.pallas import tpu as pltpu

LANE = 128
SUBLANE = 8


def _round_up(x, m):
    return (x + m - 1) // m * m


def _tower_kernel(TB, ids_ref, emb_ref, w1_ref, b1_ref, w2_ref, b2_ref, o_ref):
    """One (tower, batch-tile) grid step: embedding gather + Linear->ReLU->Linear."""
    t = pl.program_id(0)            # tower index: 0 = user, 1 = video
    base = pl.program_id(1) * TB    # first batch row of this tile

    # Fused embedding gather: ids live in SMEM (scalar prefetch); this tower's
    # padded table is VMEM-resident.  Statically unrolled dynamic-row loads.
    rows = [emb_ref[0, pl.ds(ids_ref[t, base + i], 1), :] for i in range(TB)]
    x = jnp.concatenate(rows, axis=0).astype(jnp.bfloat16)          # (TB, E_pad)

    # Linear -> ReLU -> Linear: bf16 operands on the MXU, f32 accumulation,
    # bias-add and ReLU in f32.
    h = jnp.dot(x, w1_ref[0], preferred_element_type=jnp.float32) + b1_ref[0]
    h = jnp.maximum(h, 0.0)
    o = jnp.dot(h.astype(jnp.bfloat16), w2_ref[0],
                preferred_element_type=jnp.float32) + b2_ref[0]
    o_ref[0] = o.astype(o_ref.dtype)


def two_tower_pallas(packed, user_id, video_id):
    """Returns (2, B_pad, E_pad) f32: tower 0 = user outputs, tower 1 = video."""
    emb, w1, b1 = packed["emb"], packed["w1"], packed["b1"]
    w2, b2 = packed["w2"], packed["b2"]
    _, R_pad, E_pad = emb.shape
    H_pad = w1.shape[2]
    B = user_id.shape[0]

    # Batch tiling: weights / tables stay resident across batch tiles.  TB is
    # capped so the unrolled in-kernel gather stays small; for very large B
    # switch the gather to an Element-BlockSpec / DMA gather.
    TB = min(64, _round_up(B, SUBLANE))
    B_pad = _round_up(B, TB)
    nb = B_pad // TB

    ids = jnp.stack([user_id, video_id]).astype(jnp.int32)          # (2, B)
    ids = jnp.pad(ids, ((0, 0), (0, B_pad - B)))                    # pad rows -> id 0

    kernel = functools.partial(_tower_kernel, TB)
    stay = lambda t, j, ids: (t, 0, 0)   # per-tower block, resident across batch tiles

    flops = 2 * 2 * B_pad * (E_pad * H_pad + H_pad * E_pad)
    bytes_accessed = sum(int(a.size) * a.dtype.itemsize
                         for a in (ids, emb, w1, b1, w2, b2))
    bytes_accessed += 2 * B_pad * E_pad * 4  # output

    return pl.pallas_call(
        kernel,
        out_shape=jax.ShapeDtypeStruct((2, B_pad, E_pad), jnp.float32),
        grid_spec=pltpu.PrefetchScalarGridSpec(
            num_scalar_prefetch=1,
            grid=(2, nb),
            in_specs=[
                pl.BlockSpec((1, R_pad, E_pad), stay),   # embedding tables (f32)
                pl.BlockSpec((1, E_pad, H_pad), stay),   # W1 (bf16)
                pl.BlockSpec((1, 1, H_pad),     stay),   # b1 (f32)
                pl.BlockSpec((1, H_pad, E_pad), stay),   # W2 (bf16)
                pl.BlockSpec((1, 1, E_pad),     stay),   # b2 (f32)
            ],
            out_specs=pl.BlockSpec((1, TB, E_pad), lambda t, j, ids: (t, j, 0)),
        ),
        compiler_params=pltpu.CompilerParams(
            dimension_semantics=("parallel", "parallel"),
            vmem_limit_bytes=32 << 20,
        ),
        cost_estimate=pl.CostEstimate(flops=flops, transcendentals=0,
                                      bytes_accessed=bytes_accessed),
    )(ids, emb, w1, b1, w2, b2)


def two_tower_forward(packed, user_id, video_id, *, embedding_dim):
    B = user_id.shape[0]
    out = two_tower_pallas(packed, user_id, video_id)
    return out[0, :B, :embedding_dim], out[1, :B, :embedding_dim]


def init_params(key, num_users, num_videos, embedding_dim, hidden_dim):
    """Logical (unpadded, f32) parameters matching PyTorch default init."""
    ks = jax.random.split(key, 10)
    p = {}
    # nn.Embedding default init ~ N(0, 1)
    p["user_emb"] = jax.random.normal(ks[0], (num_users, embedding_dim), jnp.float32)
    p["video_emb"] = jax.random.normal(ks[1], (num_videos, embedding_dim), jnp.float32)

    def linear(kw, kb, fan_in, fan_out):
        # nn.Linear default: U(-1/sqrt(fan_in), 1/sqrt(fan_in)); stored as (in, out)
        bound = 1.0 / jnp.sqrt(fan_in)
        w = jax.random.uniform(kw, (fan_in, fan_out), jnp.float32, -bound, bound)
        b = jax.random.uniform(kb, (fan_out,), jnp.float32, -bound, bound)
        return w, b

    p["u_w1"], p["u_b1"] = linear(ks[2], ks[3], embedding_dim, hidden_dim)
    p["u_w2"], p["u_b2"] = linear(ks[4], ks[5], hidden_dim, embedding_dim)
    p["v_w1"], p["v_b1"] = linear(ks[6], ks[7], embedding_dim, hidden_dim)
    p["v_w2"], p["v_b2"] = linear(ks[8], ks[9], hidden_dim, embedding_dim)
    return p


def pack_params(p):
    """Stack both towers on a leading axis and zero-pad feature dims to 128 lanes."""
    E = p["user_emb"].shape[1]
    H = p["u_w1"].shape[1]
    E_pad = _round_up(E, LANE)
    H_pad = _round_up(H, LANE)
    R_pad = _round_up(max(p["user_emb"].shape[0], p["video_emb"].shape[0]), SUBLANE)

    def pad2(a, r, c):
        return jnp.pad(a, ((0, r - a.shape[0]), (0, c - a.shape[1])))

    def pad1(a, c):
        return jnp.pad(a, (0, c - a.shape[0]))

    return {
        # tables kept f32 (tiny); activations are cast to bf16 inside the kernel
        "emb": jnp.stack([pad2(p["user_emb"], R_pad, E_pad),
                          pad2(p["video_emb"], R_pad, E_pad)]),
        "w1": jnp.stack([pad2(p["u_w1"], E_pad, H_pad),
                         pad2(p["v_w1"], E_pad, H_pad)]).astype(jnp.bfloat16),
        "b1": jnp.stack([pad1(p["u_b1"], H_pad),
                         pad1(p["v_b1"], H_pad)]).reshape(2, 1, H_pad),
        "w2": jnp.stack([pad2(p["u_w2"], H_pad, E_pad),
                         pad2(p["v_w2"], H_pad, E_pad)]).astype(jnp.bfloat16),
        "b2": jnp.stack([pad1(p["u_b2"], E_pad),
                         pad1(p["v_b2"], E_pad)]).reshape(2, 1, E_pad),
    }


if __name__ == "__main__":
    num_users, num_videos = 16, 24
    embedding_dim, hidden_dim = 32, 64
    batch = 8

    key = jax.random.PRNGKey(0)
    kp, ku, kv = jax.random.split(key, 3)
    params = init_params(kp, num_users, num_videos, embedding_dim, hidden_dim)
    packed = pack_params(params)

    user_id = jax.random.randint(ku, (batch,), 0, num_users, dtype=jnp.int32)
    video_id = jax.random.randint(kv, (batch,), 0, num_videos, dtype=jnp.int32)

    fwd = jax.jit(functools.partial(two_tower_forward, embedding_dim=embedding_dim))
    user_out, video_out = fwd(packed, user_id, video_id)
    jax.block_until_ready((user_out, video_out))

    # Reference in plain f32 JAX (PyTorch semantics).  Kernel uses bf16 MXU
    # operands with f32 accumulation, so tolerance is relaxed accordingly.
    def ffn_ref(x, w1, b1, w2, b2):
        return jnp.maximum(x @ w1 + b1, 0.0) @ w2 + b2

    u_ref = ffn_ref(jnp.take(params["user_emb"], user_id, axis=0),
                    params["u_w1"], params["u_b1"], params["u_w2"], params["u_b2"])
    v_ref = ffn_ref(jnp.take(params["video_emb"], video_id, axis=0),
                    params["v_w1"], params["v_b1"], params["v_w2"], params["v_b2"])

    assert user_out.shape == (batch, embedding_dim)
    assert video_out.shape == (batch, embedding_dim)
    assert jnp.allclose(user_out, u_ref, atol=5e-2, rtol=5e-2), "user tower mismatch"
    assert jnp.allclose(video_out, v_ref, atol=5e-2, rtol=5e-2), "video tower mismatch"

    print("KERNEL_OK")
</pallas_src>

<mosaic_0001>
module attributes {stable_mosaic.version = 11 : i64} {
  func.func @_tower_kernel(%arg0: i32, %arg1: i32, %arg2: memref<2x8xi32, #tpu.memory_space<smem>>, %arg3: memref<1x24x128xf32, #tpu.memory_space<vmem>>, %arg4: memref<1x128x128xbf16, #tpu.memory_space<vmem>>, %arg5: memref<1x1x128xf32, #tpu.memory_space<vmem>>, %arg6: memref<1x128x128xbf16, #tpu.memory_space<vmem>>, %arg7: memref<1x1x128xf32, #tpu.memory_space<vmem>>, %arg8: memref<1x8x128xf32, #tpu.memory_space<vmem>>) attributes {dimension_semantics = [#tpu.dimension_semantics<parallel>, #tpu.dimension_semantics<parallel>], iteration_bounds = array<i64: 2, 1>, scalar_prefetch = 1 : i64, scratch_operands = 0 : i64, tpu.core_type = #tpu.core_type<tc>, window_params = [{transform_indices = @transform_0, window_bounds = array<i64: 1, 24, 128>}, {transform_indices = @transform_1, window_bounds = array<i64: 1, 128, 128>}, {transform_indices = @transform_2, window_bounds = array<i64: 1, 1, 128>}, {transform_indices = @transform_3, window_bounds = array<i64: 1, 128, 128>}, {transform_indices = @transform_4, window_bounds = array<i64: 1, 1, 128>}, {transform_indices = @transform_5, window_bounds = array<i64: 1, 8, 128>}]} {
    %c8_i32 = arith.constant 8 : i32
    %0 = arith.muli %arg1, %c8_i32 : i32
    %c0_i32 = arith.constant 0 : i32
    %1 = arith.addi %0, %c0_i32 : i32
    %2 = arith.index_cast %arg0 : i32 to index
    %3 = arith.index_cast %1 : i32 to index
    %4 = memref.load %arg2[%2, %3] : memref<2x8xi32, #tpu.memory_space<smem>>
    %c0 = arith.constant 0 : index
    %5 = arith.index_cast %4 : i32 to index
    %c0_0 = arith.constant 0 : index
    %6 = vector.load %arg3[%c0, %5, %c0_0] : memref<1x24x128xf32, #tpu.memory_space<vmem>>, vector<1x1x128xf32>
    %7 = vector.shape_cast %6 : vector<1x1x128xf32> to vector<1x128xf32>
    %c1_i32 = arith.constant 1 : i32
    %8 = arith.addi %0, %c1_i32 : i32
    %9 = arith.index_cast %arg0 : i32 to index
    %10 = arith.index_cast %8 : i32 to index
    %11 = memref.load %arg2[%9, %10] : memref<2x8xi32, #tpu.memory_space<smem>>
    %c0_1 = arith.constant 0 : index
    %12 = arith.index_cast %11 : i32 to index
    %c0_2 = arith.constant 0 : index
    %13 = vector.load %arg3[%c0_1, %12, %c0_2] : memref<1x24x128xf32, #tpu.memory_space<vmem>>, vector<1x1x128xf32>
    %14 = vector.shape_cast %13 : vector<1x1x128xf32> to vector<1x128xf32>
    %c2_i32 = arith.constant 2 : i32
    %15 = arith.addi %0, %c2_i32 : i32
    %16 = arith.index_cast %arg0 : i32 to index
    %17 = arith.index_cast %15 : i32 to index
    %18 = memref.load %arg2[%16, %17] : memref<2x8xi32, #tpu.memory_space<smem>>
    %c0_3 = arith.constant 0 : index
    %19 = arith.index_cast %18 : i32 to index
    %c0_4 = arith.constant 0 : index
    %20 = vector.load %arg3[%c0_3, %19, %c0_4] : memref<1x24x128xf32, #tpu.memory_space<vmem>>, vector<1x1x128xf32>
    %21 = vector.shape_cast %20 : vector<1x1x128xf32> to vector<1x128xf32>
    %c3_i32 = arith.constant 3 : i32
    %22 = arith.addi %0, %c3_i32 : i32
    %23 = arith.index_cast %arg0 : i32 to index
    %24 = arith.index_cast %22 : i32 to index
    %25 = memref.load %arg2[%23, %24] : memref<2x8xi32, #tpu.memory_space<smem>>
    %c0_5 = arith.constant 0 : index
    %26 = arith.index_cast %25 : i32 to index
    %c0_6 = arith.constant 0 : index
    %27 = vector.load %arg3[%c0_5, %26, %c0_6] : memref<1x24x128xf32, #tpu.memory_space<vmem>>, vector<1x1x128xf32>
    %28 = vector.shape_cast %27 : vector<1x1x128xf32> to vector<1x128xf32>
    %c4_i32 = arith.constant 4 : i32
    %29 = arith.addi %0, %c4_i32 : i32
    %30 = arith.index_cast %arg0 : i32 to index
    %31 = arith.index_cast %29 : i32 to index
    %32 = memref.load %arg2[%30, %31] : memref<2x8xi32, #tpu.memory_space<smem>>
    %c0_7 = arith.constant 0 : index
    %33 = arith.index_cast %32 : i32 to index
    %c0_8 = arith.constant 0 : index
    %34 = vector.load %arg3[%c0_7, %33, %c0_8] : memref<1x24x128xf32, #tpu.memory_space<vmem>>, vector<1x1x128xf32>
    %35 = vector.shape_cast %34 : vector<1x1x128xf32> to vector<1x128xf32>
    %c5_i32 = arith.constant 5 : i32
    %36 = arith.addi %0, %c5_i32 : i32
    %37 = arith.index_cast %arg0 : i32 to index
    %38 = arith.index_cast %36 : i32 to index
    %39 = memref.load %arg2[%37, %38] : memref<2x8xi32, #tpu.memory_space<smem>>
    %c0_9 = arith.constant 0 : index
    %40 = arith.index_cast %39 : i32 to index
    %c0_10 = arith.constant 0 : index
    %41 = vector.load %arg3[%c0_9, %40, %c0_10] : memref<1x24x128xf32, #tpu.memory_space<vmem>>, vector<1x1x128xf32>
    %42 = vector.shape_cast %41 : vector<1x1x128xf32> to vector<1x128xf32>
    %c6_i32 = arith.constant 6 : i32
    %43 = arith.addi %0, %c6_i32 : i32
    %44 = arith.index_cast %arg0 : i32 to index
    %45 = arith.index_cast %43 : i32 to index
    %46 = memref.load %arg2[%44, %45] : memref<2x8xi32, #tpu.memory_space<smem>>
    %c0_11 = arith.constant 0 : index
    %47 = arith.index_cast %46 : i32 to index
    %c0_12 = arith.constant 0 : index
    %48 = vector.load %arg3[%c0_11, %47, %c0_12] : memref<1x24x128xf32, #tpu.memory_space<vmem>>, vector<1x1x128xf32>
    %49 = vector.shape_cast %48 : vector<1x1x128xf32> to vector<1x128xf32>
    %c7_i32 = arith.constant 7 : i32
    %50 = arith.addi %0, %c7_i32 : i32
    %51 = arith.index_cast %arg0 : i32 to index
    %52 = arith.index_cast %50 : i32 to index
    %53 = memref.load %arg2[%51, %52] : memref<2x8xi32, #tpu.memory_space<smem>>
    %c0_13 = arith.constant 0 : index
    %54 = arith.index_cast %53 : i32 to index
    %c0_14 = arith.constant 0 : index
    %55 = vector.load %arg3[%c0_13, %54, %c0_14] : memref<1x24x128xf32, #tpu.memory_space<vmem>>, vector<1x1x128xf32>
    %56 = vector.shape_cast %55 : vector<1x1x128xf32> to vector<1x128xf32>
    %57 = tpu.concatenate %7, %14, %21, %28, %35, %42, %49, %56 in 0 : vector<1x128xf32>, vector<1x128xf32>, vector<1x128xf32>, vector<1x128xf32>, vector<1x128xf32>, vector<1x128xf32>, vector<1x128xf32>, vector<1x128xf32> -> vector<8x128xf32>
    %58 = arith.truncf %57 : vector<8x128xf32> to vector<8x128xbf16>
    %c0_15 = arith.constant 0 : index
    %c0_16 = arith.constant 0 : index
    %c0_17 = arith.constant 0 : index
    %59 = vector.load %arg4[%c0_15, %c0_16, %c0_17] : memref<1x128x128xbf16, #tpu.memory_space<vmem>>, vector<1x128x128xbf16>
    %60 = vector.shape_cast %59 : vector<1x128x128xbf16> to vector<128x128xbf16>
    %cst = arith.constant dense<0.000000e+00> : vector<8x128xf32>
    %61 = tpu.matmul %58, %60, %cst {dimension_numbers = #tpu.dot_dimension_numbers<[1], [0], [0], [1], [0, 0, 1, 1], [], []>} : vector<8x128xbf16>, vector<128x128xbf16>, vector<8x128xf32> -> vector<8x128xf32>
    %c0_18 = arith.constant 0 : index
    %c0_19 = arith.constant 0 : index
    %c0_20 = arith.constant 0 : index
    %62 = vector.load %arg5[%c0_18, %c0_19, %c0_20] : memref<1x1x128xf32, #tpu.memory_space<vmem>>, vector<1x1x128xf32>
    %63 = vector.shape_cast %62 : vector<1x1x128xf32> to vector<1x128xf32>
    %64 = vector.broadcast %63 : vector<1x128xf32> to vector<8x128xf32>
    %65 = arith.addf %61, %64 : vector<8x128xf32>
    %cst_21 = arith.constant 0.000000e+00 : f32
    %66 = vector.broadcast %cst_21 : f32 to vector<8x128xf32>
    %67 = arith.maximumf %65, %66 : vector<8x128xf32>
    %68 = arith.truncf %67 : vector<8x128xf32> to vector<8x128xbf16>
    %c0_22 = arith.constant 0 : index
    %c0_23 = arith.constant 0 : index
    %c0_24 = arith.constant 0 : index
    %69 = vector.load %arg6[%c0_22, %c0_23, %c0_24] : memref<1x128x128xbf16, #tpu.memory_space<vmem>>, vector<1x128x128xbf16>
    %70 = vector.shape_cast %69 : vector<1x128x128xbf16> to vector<128x128xbf16>
    %cst_25 = arith.constant dense<0.000000e+00> : vector<8x128xf32>
    %71 = tpu.matmul %68, %70, %cst_25 {dimension_numbers = #tpu.dot_dimension_numbers<[1], [0], [0], [1], [0, 0, 1, 1], [], []>} : vector<8x128xbf16>, vector<128x128xbf16>, vector<8x128xf32> -> vector<8x128xf32>
    %c0_26 = arith.constant 0 : index
    %c0_27 = arith.constant 0 : index
    %c0_28 = arith.constant 0 : index
    %72 = vector.load %arg7[%c0_26, %c0_27, %c0_28] : memref<1x1x128xf32, #tpu.memory_space<vmem>>, vector<1x1x128xf32>
    %73 = vector.shape_cast %72 : vector<1x1x128xf32> to vector<1x128xf32>
    %74 = vector.broadcast %73 : vector<1x128xf32> to vector<8x128xf32>
    %75 = arith.addf %71, %74 : vector<8x128xf32>
    %c0_29 = arith.constant 0 : index
    %c0_30 = arith.constant 0 : index
    %c0_31 = arith.constant 0 : index
    %76 = vector.load %arg8[%c0_29, %c0_30, %c0_31] : memref<1x8x128xf32, #tpu.memory_space<vmem>>, vector<1x8x128xf32>
    %77 = vector.shape_cast %76 : vector<1x8x128xf32> to vector<8x128xf32>
    %78 = vector.shape_cast %75 : vector<8x128xf32> to vector<1x8x128xf32>
    tpu.vector_store %arg8[%c0_29, %c0_30, %c0_31], %78 {strides = array<i32>} : memref<1x8x128xf32, #tpu.memory_space<vmem>>, vector<1x8x128xf32>,
    return
  }
  func.func @transform_0(%arg0: i32, %arg1: i32, %arg2: memref<2x8xi32, #tpu.memory_space<smem>>) -> (i32, i32, i32) {
    %c0_i32 = arith.constant 0 : i32
    %c0_i32_0 = arith.constant 0 : i32
    %c0_i32_1 = arith.constant 0 : i32
    return %arg0, %c0_i32, %c0_i32_0 : i32, i32, i32
  }
  func.func @transform_1(%arg0: i32, %arg1: i32, %arg2: memref<2x8xi32, #tpu.memory_space<smem>>) -> (i32, i32, i32) {
    %c0_i32 = arith.constant 0 : i32
    %c0_i32_0 = arith.constant 0 : i32
    %c0_i32_1 = arith.constant 0 : i32
    return %arg0, %c0_i32, %c0_i32_0 : i32, i32, i32
  }
  func.func @transform_2(%arg0: i32, %arg1: i32, %arg2: memref<2x8xi32, #tpu.memory_space<smem>>) -> (i32, i32, i32) {
    %c0_i32 = arith.constant 0 : i32
    %c0_i32_0 = arith.constant 0 : i32
    %c0_i32_1 = arith.constant 0 : i32
    return %arg0, %c0_i32, %c0_i32_0 : i32, i32, i32
  }
  func.func @transform_3(%arg0: i32, %arg1: i32, %arg2: memref<2x8xi32, #tpu.memory_space<smem>>) -> (i32, i32, i32) {
    %c0_i32 = arith.constant 0 : i32
    %c0_i32_0 = arith.constant 0 : i32
    %c0_i32_1 = arith.constant 0 : i32
    return %arg0, %c0_i32, %c0_i32_0 : i32, i32, i32
  }
  func.func @transform_4(%arg0: i32, %arg1: i32, %arg2: memref<2x8xi32, #tpu.memory_space<smem>>) -> (i32, i32, i32) {
    %c0_i32 = arith.constant 0 : i32
    %c0_i32_0 = arith.constant 0 : i32
    %c0_i32_1 = arith.constant 0 : i32
    return %arg0, %c0_i32, %c0_i32_0 : i32, i32, i32
  }
  func.func @transform_5(%arg0: i32, %arg1: i32, %arg2: memref<2x8xi32, #tpu.memory_space<smem>>) -> (i32, i32, i32) {
    %c0_i32 = arith.constant 0 : i32
    %c0_i32_0 = arith.constant 0 : i32
    return %arg0, %arg1, %c0_i32 : i32, i32, i32
  }
}

</mosaic_0001>

<bundles_post_ra>
// kernel: two_tower_forward.1
= control target key start
LH: loop header
LB: loop body
LE: loop exit
PB: predicated region body
PF: predicated region fallthrough
CT: control target
= control target key end

     0   :  { %s1579_s0 = inlined_call_operand.vmem [shape: s32[2,8], index: 0, kind: input, shape index: {}]   ;;  %s1580_s1 = inlined_call_operand.hbm [shape: f32[2,24,128], index: 1, kind: input, shape index: {}]   ;;  %s1581_s2 = inlined_call_operand.hbm [shape: bf16[2,128,128], index: 2, kind: input, shape index: {}]   ;;  %s1582_s3 = inlined_call_operand.vmem [shape: f32[2,1,128], index: 3, kind: input, shape index: {}]   ;;  %s1583_s4 = inlined_call_operand.hbm [shape: bf16[2,128,128], index: 4, kind: input, shape index: {}]   ;;  %s1584_s5 = inlined_call_operand.vmem [shape: f32[2,1,128], index: 5, kind: input, shape index: {}]   ;;  %s1585_s6 = inlined_call_operand.vmem [shape: f32[2,8,128], index: 6, kind: output, shape index: {}]  }
   0x1   :  { %1591 = sst [smem:[#allocation12_spill]] %s1580_s1  ;;  %s11_s23 = sshll.u32 %s1579_s0, 4  ;;  %s12_s23 = int_to_ptr.vmem [resolvable:$true] %s11_s23 }
   0x2   :  { %1592 = sst [smem:[#allocation13_spill]] %s1581_s2  ;;  %s1071_s24 = scalar_lea.vmem %s12_s23, 32 }
   0x3   :  { %p1072_p0 = scmp.ne.s32.totalorder %s12_s23, %s1071_s24  ;;  %p1076_p1 = scmp.lt.s32.totalorder %s12_s23, %s12_s23 }
   0x4   :  { %p1077_p2 = scmp.lt.s32.totalorder %s1071_s24, %s1071_s24 }
   0x6   :  { %p1078_p3 = por %p1077_p2, %p1076_p1 }
   0x8   :  { %p1079_p4 = pnand %p1078_p3, %p1072_p0 }
   0xa   :  { %1082 = shalt.err (!%p1079_p4)  }
   0xb   :  { %s1231_s25 = smov [#allocation3]  }
   0xc   :  { %14 = dma.vmem_to_smem %s12_s23, 32, %s1231_s25, [#allocation2] }
   0xd   :  { %1197 = dma.done.wait [#allocation2], 32 }
   0xe   :  { %1198 = vsyncadd [#allocation2], 4294967264 }
   0xf   :  { %16 = sfence }
  0x10   :  { %17 = vsyncpa [#allocation5], 0 }
  0x11   :  { %19 = vsyncpa [#allocation5 + $0x1], 0 }
  0x12   :  { %20 = vsyncpa [#allocation7], 0 }
  0x13   :  { %22 = vsyncpa [#allocation7 + $0x1], 0  ;;  %s1279_s26 = smov 0   ;;  %s1281_s0 = smov 0  }
  0x14   :  { %s1283_s27 = smov 0   ;;  %s1285_s28 = smov 0  }
  0x15   :  { %s1287_s29 = smov 0   ;;  %s1289_s30 = smov 0  }
  0x16 LB: > { %s1587_s7 = sadd.s32 4294967295, %s1229_s30   ;;  %s40_s8 = sadd.s32 1, %s1225_s29  ;;  %s1229_s30 = sphi %s1289_s30, %s28_s30   ;;  %s1225_s29 = sphi %s1287_s29, %s1609_s29   ;;  %s1221_s28 = sphi %s1285_s28, %s1608_s28   ;;  %s1217_s27 = sphi %s1283_s27, %s1607_s27   ;;  %s1213_s0 = sphi %s1281_s0, %s1606_s0   ;;  %s1209_s26 = sphi %s1279_s26, %s1605_s26  }
  0x17   : > { %p42_p5 = scmp.ge.s32.totalorder %s40_s8, 2  ;;  %s47_s9 = sadd.s32 1, %s1217_s27 }
  0x18   : > { %p54_p6 = scmp.ne.s32.totalorder %s1217_s27, %s1213_s0  ;;  %p55_p7 = scmp.eq.s32.totalorder %s1229_s30, 0 }
  0x19   : > { %s1611_s8 = smov (%p42_p5, %s40_s8), 0  ;;  %p60_p9 = scmp.ne.s32.totalorder %s1213_s0, %s1209_s26 }
  0x1a   : > { %p56_p8 = por %p55_p7, %p54_p6  ;;  %s44_s10 = ssub.s32 %s1225_s29, %s1611_s8 }
  0x1b   : > { %p61_p10 = scmp.eq.s32.totalorder %s1587_s7, 0  ;;  %p45_p11 = scmp.eq.s32.totalorder %s44_s10, 0 }
  0x1c   : > { %p999_p13 = scmp.lt.s32.totalorder %s1229_s30, 2  ;;  %s1329_s13 = sand.u32 1, %s1217_s27  }
  0x1d   : > { %p1320_p12 = por %p61_p10, %p60_p9  ;;  %s237_s15 = sand.u32 1, %s1229_s30  }
  0x1e   : > { %s1326_s12 = scalar_select %p45_p11, %s1217_s27, %s47_s9  }
  0x1f   : > { %s1593_s11 = scalar_select %p1320_p12, 1, 0 }
  0x20   : > { %p1331_p0 = pnand %p999_p13, %p56_p8  ;;  %s882_s16 = sshll.u32 %s1329_s13, 6 }
  0x21   : > { %s920_s17 = sshll.u32 %s1225_s29, 10  ;;  %s1595_s2 = sld [smem:[#allocation13_spill]] }
  0x22   : > { %s241_s21 = scalar_lea.vmem [#allocation6], %s882_s16  ;;  %s1349_s23 = scalar_lea.sflag [#allocation7], %s237_s15 }
  0x23   : > { %s248_s22 = sshll.u32 %s241_s21, 4  ;;  %p1355_p2 = pneg %p1331_p0  ;;  %s1347_s22 = int_to_ptr.vmem [resolvable:$true] %s248_s22 }
  0x27   : > { %s1343_s20 = scalar_lea.hbm %s1595_s2, %s920_s17  ;;  %s1088_s10 = scalar_lea.hbm %s1595_s2, 2048 }
  0x28   : > { %s1083_s24 = scalar_lea.hbm %s1343_s20, 1024  ;;  %p1089_p5 = scmp.lt.u32.totalorder %s1343_s20, %s1595_s2 }
  0x29   : > { %p1084_p1 = scmp.ne.s32.totalorder %s1343_s20, %s1083_s24  ;;  %p1090_p6 = scmp.lt.u32.totalorder %s1088_s10, %s1083_s24 }
  0x2a   : > { %p1092_p8 = scmp.lt.u32.totalorder %s1083_s24, %s1343_s20 }
  0x2b   : > { %p1086_p3 = pnand %p1355_p2, %p1084_p1  ;;  %p1091_p7 = por %p1090_p6, %p1089_p5 }
  0x2d   : > { %p1087_p4 = pneg %p1086_p3  ;;  %p1093_p9 = por %p1092_p8, %p1091_p7 }
  0x2f   : > { %p1094_p10 = pnand %p1093_p9, %p1087_p4 }
  0x31   : > { %1097 = shalt.err (!%p1094_p10)
}
  0x32   : > { %s1098_s15 = scalar_lea.vmem %s1347_s22, 1024  ;;  %s1232_s21 = smov [#allocation6]  }
  0x33   : > { %p1099_p11 = scmp.ne.s32.totalorder %s1347_s22, %s1098_s15  ;;  %s1103_s26 = sshll.u32 %s1232_s21, 4  ;;  %s1104_s26 = int_to_ptr.vmem [resolvable:$false] %s1103_s26 }
  0x34   : > { %s1105_s9 = scalar_lea.vmem %s1104_s26, 2048  ;;  %p1106_p3 = scmp.lt.s32.totalorder %s1347_s22, %s1104_s26 }
  0x35   : > { %p1101_p13 = pnand %p1099_p11, %p1355_p2  ;;  %p1107_p12 = scmp.lt.s32.totalorder %s1105_s9, %s1098_s15 }
  0x37   : > { %p1102_p1 = pneg %p1101_p13  ;;  %p1108_p5 = por %p1107_p12, %p1106_p3 }
  0x39   : > { %p1109_p6 = pnand %p1108_p5, %p1102_p1 }
  0x3b   : > { %1112 = shalt.err (!%p1109_p6)
}
  0x3c   : > { %s1588_s24 = smov 64   ;;  %s1589_s10 = smov 4  }
  0x3d   : > { %995 = dma.hbm_to_vmem [thread:$0]  (!%p1331_p0), %s1343_s20, 1024, %s1347_s22, %s1349_s23, %s1588_s24, %s1588_s24, %s1589_s10  }
  0x3e   : > { %s1387_s15 = scalar_lea.hbm %s1583_s4, %s920_s17  ;;  %s268_s21 = scalar_lea.vmem [#allocation8], %s882_s16 }
  0x3f   : > { %s275_s26 = sshll.u32 %s268_s21, 4  ;;  %p888_p12 = scmp.ge.s32.totalorder %s1229_s30, 1  ;;  %s1391_s26 = int_to_ptr.vmem [resolvable:$true] %s275_s26 }
  0x40   : > { %p289_p4 = scmp.lt.s32.totalorder %s1229_s30, 3  ;;  %s980_s7 = smul.u32 24, %s1329_s13 }
  0x41   : > { %s981_s20 = smul.u32 384, %s1225_s29  ;;  %s1598_s1 = sld [smem:[#allocation12_spill]] }
  0x42   : > { %p1395_p7 = pnand %p888_p12, %p289_p4  ;;  %s220_s16 = scalar_lea.vmem [#allocation4], %s980_s7 }
  0x43   : > { %s227_s17 = sshll.u32 %s220_s16, 4  ;;  %s217_s19 = scalar_lea.sflag [#allocation5], %s1329_s13  ;;  %s1406_s17 = int_to_ptr.vmem [resolvable:$true] %s227_s17 }
  0x44   : > { %s1597_s9 = scalar_select %p1395_p7, 1, 0 }
  0x47   : > { %s1404_s18 = scalar_lea.hbm %s1598_s1, %s981_s20  ;;  %s1118_s24 = scalar_lea.hbm %s1598_s1, 768 }
  0x48   : > { %s1113_s21 = scalar_lea.hbm %s1404_s18, 384  ;;  %p1119_p11 = scmp.lt.u32.totalorder %s1404_s18, %s1598_s1 }
  0x49   : > { %p1114_p8 = scmp.ne.s32.totalorder %s1404_s18, %s1113_s21  ;;  %p1120_p13 = scmp.lt.u32.totalorder %s1118_s24, %s1113_s21 }
  0x4a   : > { %p1122_p3 = scmp.lt.u32.totalorder %s1113_s21, %s1404_s18 }
  0x4b   : > { %p1116_p9 = pnand %p1114_p8, %p1355_p2  ;;  %p1121_p1 = por %p1120_p13, %p1119_p11 }
  0x4d   : > { %p1117_p10 = pneg %p1116_p9  ;;  %p1123_p5 = por %p1122_p3, %p1121_p1 }
  0x4f   : > { %p1124_p6 = pnand %p1123_p5, %p1117_p10 }
  0x51   : > { %1127 = shalt.err (!%p1124_p6)
}
  0x52   : > { %s1128_s7 = scalar_lea.vmem %s1406_s17, 384  ;;  %s1235_s2 = smov [#allocation4]  }
  0x53   : > { %p1129_p12 = scmp.ne.s32.totalorder %s1406_s17, %s1128_s7  ;;  %s1133_s10 = sshll.u32 %s1235_s2, 4  ;;  %s1134_s10 = int_to_ptr.vmem [resolvable:$false] %s1133_s10 }
  0x54   : > { %s1135_s16 = scalar_lea.vmem %s1134_s10, 768  ;;  %p1136_p9 = scmp.lt.s32.totalorder %s1406_s17, %s1134_s10 }
  0x55   : > { %p1131_p4 = pnand %p1129_p12, %p1355_p2  ;;  %p1137_p7 = scmp.lt.s32.totalorder %s1135_s16, %s1128_s7 }
  0x57   : > { %p1132_p8 = pneg %p1131_p4  ;;  %p1138_p11 = por %p1137_p7, %p1136_p9 }
  0x59   : > { %p1139_p13 = pnand %p1138_p11, %p1132_p8 }
  0x5b   : > { %1142 = shalt.err (!%p1139_p13)
}
  0x5c   : > { %s1236_s21 = smov 128   ;;  %s1237_s24 = smov 8  }
  0x5d   : > { %992 = dma.hbm_to_vmem [thread:$0]  (!%p1331_p0), %s1404_s18, 384, %s1406_s17, %s217_s19, %s1236_s21, %s1236_s21, %s1237_s24  }
  0x5e   : > { %s1143_s20 = scalar_lea.hbm %s1387_s15, 1024  ;;  %s1148_s2 = scalar_lea.hbm %s1583_s4, 2048 }
  0x5f   : > { %p1144_p10 = scmp.ne.s32.totalorder %s1387_s15, %s1143_s20  ;;  %p1149_p3 = scmp.lt.u32.totalorder %s1387_s15, %s1583_s4 }
  0x60   : > { %p1150_p5 = scmp.lt.u32.totalorder %s1148_s2, %s1143_s20  ;;  %p1152_p12 = scmp.lt.u32.totalorder %s1143_s20, %s1387_s15 }
  0x61   : > { %p1146_p7 = pnand %p1144_p10, %p1355_p2 }
  0x62   : > { %p1151_p6 = por %p1150_p5, %p1149_p3 }
  0x63   : > { %p1147_p1 = pneg %p1146_p7 }
  0x64   : > { %p1153_p4 = por %p1152_p12, %p1151_p6 }
  0x66   : > { %p1154_p8 = pnand %p1153_p4, %p1147_p1 }
  0x68   : > { %1157 = shalt.err (!%p1154_p8)
}
  0x69   : > { %s1158_s13 = scalar_lea.vmem %s1391_s26, 1024  ;;  %s1238_s18 = smov [#allocation8]  }
  0x6a   : > { %p1159_p9 = scmp.ne.s32.totalorder %s1391_s26, %s1158_s13  ;;  %s1163_s17 = sshll.u32 %s1238_s18, 4  ;;  %s1164_s17 = int_to_ptr.vmem [resolvable:$false] %s1163_s17 }
  0x6b   : > { %s1165_s19 = scalar_lea.vmem %s1164_s17, 2048  ;;  %p1166_p10 = scmp.lt.s32.totalorder %s1391_s26, %s1164_s17 }
  0x6c   : > { %p1161_p11 = pnand %p1159_p9, %p1355_p2  ;;  %p1167_p7 = scmp.lt.s32.totalorder %s1165_s19, %s1158_s13 }
  0x6e   : > { %p1162_p13 = pneg %p1161_p11  ;;  %p1168_p3 = por %p1167_p7, %p1166_p10 }
  0x70   : > { %p1169_p5 = pnand %p1168_p3, %p1162_p13 }
  0x72   : > { %1172 = shalt.err (!%p1169_p5)
}
  0x73   : > { %s1599_s21 = smov 4   ;;  %s1600_s24 = smov 64  }
  0x74   : > { %998 = dma.hbm_to_vmem [thread:$0]  (!%p1331_p0), %s1387_s15, 1024, %s1391_s26, %s1349_s23, %s1600_s24, %s1600_s24, %s1599_s21  }
  0x75   : > { %p1601_p2 = scmp.ne.s32.totalorder %s1597_s9, 0 }
  0x76   : > { %s1460_s25 = sand.u32 (!%p1601_p2), 1, %s1213_s0   ;;  %p1602_p1 = scmp.ne.s32.totalorder (!%p1601_p2), %s1593_s11, 0 }
  0x77   : > { %293 = sbr.rel (%p1601_p2) target bundleno = 598 (0x256), region = 40  ;;  %s296_s22 = scalar_lea.sflag (!%p1601_p2), [#allocation5], %s1460_s25 }
  0x78   : > { %s982_s20 = smul.u32 (!%p1601_p2), 24, %s1460_s25 }
  0x7a   : > { %s1464_s7 = scalar_lea.vmem (!%p1601_p2), [#allocation4], %s982_s20 }
  0x7e   : > { %1200 = dma.done.wait (%p1602_p1), %s296_s22, 384  }
  0x7f   : > { %1202 = vsyncadd (%p1602_p1), %s296_s22, 4294966912  ;;  %s1603_s14 = sadd.s32 4294967295, %s1229_s30   ;;  %s1590_s15 = sshll.u32 %s1460_s25, 6 }
  0x80   : > { %s304_s23 = sand.u32 1, %s1603_s14   ;;  %s1475_s9 = scalar_lea.vmem [#allocation6], %s1590_s15 }
  0x81   : > { %s305_s26 = scalar_lea.sflag [#allocation7], %s304_s23 }
  0x82   : > { %1204 = dma.done.wait (%p1602_p1), %s305_s26, 2048  }
  0x83   : > { %1206 = vsyncadd (%p1602_p1), %s305_s26, 4294965248  ;;  %s1482_s2 = sshll.u32 %s1221_s28, 7  ;;  %v1239_v0 = vmov 0.0   ;;  %vm1240_vm0 = vmmov 0   ;;  %v1055_v1 = vld [vmem:[%s1475_s9] sm:$0xff]   ;;  %v1056_v2 = vld [vmem:[%s1475_s9 + $0x8] sm:$0xff]  }
  0x84   : > { %940 = vmatprep.subr.bf16.mxu0 %v1239_v0  ;;  %956 = vmatprep.mubr.msk.bf16.mxu0 %vm1240_vm0, %v1239_v0  ;;  %s394_s10 = sadd.s32 1, %s1482_s2  ;;  %s1488_s11 = sld [smem:[#allocation3 + %s1482_s2]]  ;;  %v1057_v3 = vld [vmem:[%s1475_s9 + $0x10] sm:$0xff]   ;;  %vm485_vm1 = vcmask 1040384   ;;  %v1058_v8 = vld [vmem:[%s1475_s9 + $0x18] sm:$0xff]   ;;  %vm487_vm2 = vcmask 1041408  }
  0x85   : > { %s405_s16 = sadd.s32 2, %s1482_s2  ;;  %960 = vmatprep.subr.bf16.mxu1 %v1239_v0  ;;  %976 = vmatprep.mubr.msk.bf16.mxu1 %vm1240_vm0, %v1239_v0  ;;  %s395_s13 = sld [smem:[#allocation3 + %s394_s10]]  ;;  %vm489_vm3 = vcmask 1042432   ;;  %v1059_v16 = vld [vmem:[%s1475_s9 + $0x20] sm:$0xff]   ;;  %vm491_vm4 = vcmask 1043456   ;;  %v1060_v23 = vld [vmem:[%s1475_s9 + $0x28] sm:$0xff]  }
  0x86   : > { %s416_s18 = sadd.s32 3, %s1482_s2  ;;  %s406_s17 = sld [smem:[#allocation3 + %s405_s16]]  ;;  %941 = vmatpush3.bf16.msra.mxu0 %v1055_v1  ;;  %vm493_vm5 = vcmask 1044480   ;;  %vm495_vm6 = vcmask 1045504   ;;  %v1061_v29 = vld [vmem:[%s1475_s9 + $0x30] sm:$0xff]   ;;  %vm497_vm7 = vcmask 1046528  }
  0x87   : > { %s427_s19 = sadd.s32 4, %s1482_s2  ;;  %s417_s21 = sld [smem:[#allocation3 + %s416_s18]]  ;;  %942 = vmatprep.subr.bf16.mxu0 %v1239_v0  ;;  %v1062_v33 = vld [vmem:[%s1475_s9 + $0x38] sm:$0xff]  }
  0x88   : > { %s438_s24 = sadd.s32 5, %s1482_s2  ;;  %s428_s20 = sld [smem:[#allocation3 + %s427_s19]] }
  0x89   : > { %s1497_s22 = sld [smem:[#allocation3 + %s438_s24]]  ;;  %s449_s14 = sadd.s32 6, %s1482_s2 }
  0x8a   : > { %s1503_s26 = sld [smem:[#allocation3 + %s449_s14]]  ;;  %s460_s16 = sadd.s32 7, %s1482_s2  ;;  %943 = vmatpush3.bf16.msra.mxu0 %v1056_v2 }
  0x8b   : > { %s396_s23 = scalar_lea.vmem %s1464_s7, %s395_s13 [#allocation4]  ;;  %s385_s18 = scalar_lea.vmem %s1464_s7, %s1488_s11 [#allocation4]  ;;  %944 = vmatprep.subr.bf16.mxu0 %v1239_v0 }
  0x8c   : > { %s407_s10 = scalar_lea.vmem %s1464_s7, %s406_s17 [#allocation4]  ;;  %v397_v4 = vld [vmem:[%s396_s23] sm:$0x1]  ;;  %s1515_s1 = sld [smem:[#allocation3 + %s460_s16]] }
  0x8d   : > { %s418_s19 = scalar_lea.vmem %s1464_s7, %s417_s21 [#allocation4]  ;;  %v408_v5 = vld [vmem:[%s407_s10] sm:$0x1]  ;;  %v465_v10 = vrot.slane %v397_v4, 7  ;;  %s1604_s2 = sshll.u32 %s1460_s25, 6 }
  0x8e   : > { %s429_s24 = scalar_lea.vmem %s1464_s7, %s428_s20 [#allocation4]  ;;  %v386_v6 = vld [vmem:[%s385_s18] sm:$0x1]  ;;  %945 = vmatpush3.bf16.msra.mxu0 %v1057_v3  ;;  %v468_v11 = vrot.slane %v408_v5, 6  ;;  %s1521_s11 = scalar_lea.vmem [#allocation8], %s1604_s2 }
  0x8f   : > { %s440_s15 = scalar_lea.vmem %s1464_s7, %s1497_s22 [#allocation4]  ;;  %v419_v7 = vld [vmem:[%s418_s19] sm:$0x1]  ;;  %946 = vmatprep.subr.bf16.mxu0 %v1239_v0  ;;  %v486_v14 = vsel %vm485_vm1, %v386_v6, %v465_v10  ;;  %v1063_v15 = vld [vmem:[%s1521_s11] sm:$0xff]   ;;  %v1064_v20 = vld [vmem:[%s1521_s11 + $0x8] sm:$0xff]   ;;  %p362_p0 = scmp.lt.s32.totalorder %s1221_s28, 1 }
  0x90   : > { %v430_v9 = vld [vmem:[%s429_s24] sm:$0x1]  ;;  %v471_v13 = vrot.slane %v419_v7, 5  ;;  %s451_s13 = scalar_lea.vmem %s1464_s7, %s1503_s26 [#allocation4]  ;;  %v488_v18 = vsel %vm487_vm2, %v486_v14, %v468_v11  ;;  %961 = vmatpush3.bf16.msra.mxu1 %v1063_v15  ;;  %v1066_v31 = vld [vmem:[%s1521_s11 + $0x18] sm:$0xff]   ;;  %v1067_v35 = vld [vmem:[%s1521_s11 + $0x20] sm:$0xff]  }
  0x91   : > { %v441_v12 = vld [vmem:[%s440_s15] sm:$0x1]  ;;  %v474_v17 = vrot.slane %v430_v9, 4  ;;  %962 = vmatprep.subr.bf16.mxu1 %v1239_v0  ;;  %v1068_v37 = vld [vmem:[%s1521_s11 + $0x28] sm:$0xff]   ;;  %v1070_v39 = vld [vmem:[%s1521_s11 + $0x38] sm:$0xff]   ;;  %s1613_s28 = smov (!%p362_p0, %s1221_s28), 1 }
  0x92   : > { %947 = vmatpush3.bf16.msra.mxu0 %v1058_v8  ;;  %v490_v19 = vsel %vm489_vm3, %v488_v18, %v471_v13  ;;  %v452_v21 = vld [vmem:[%s451_s13] sm:$0x1]  ;;  %s462_s25 = scalar_lea.vmem %s1464_s7, %s1515_s1 [#allocation4]  ;;  %v477_v22 = vrot.slane %v441_v12, 3  ;;  %s364_s15 = scalar_lea.vmem %s1582_s3, %s1613_s28 }
  0x93   : > { %948 = vmatprep.subr.bf16.mxu0 %v1239_v0  ;;  %v492_v24 = vsel %vm491_vm4, %v490_v19, %v474_v17  ;;  %v1065_v25 = vld [vmem:[%s1521_s11 + $0x10] sm:$0xff]   ;;  %v480_v27 = vrot.slane %v452_v21, 2  ;;  %s367_s21 = scalar_lea.vmem %s1584_s5, %s1613_s28  ;;  %s891_s20 = sshll.u32 %s1613_s28, 3 }
  0x94   : > { %963 = vmatpush3.bf16.msra.mxu1 %v1064_v20  ;;  %v463_v26 = vld [vmem:[%s462_s25] sm:$0x1]  ;;  %v494_v28 = vsel %vm493_vm5, %v492_v24, %v477_v22  ;;  %s374_s23 = scalar_lea.vmem %s1585_s6, %s891_s20 }
  0x95   : > { %964 = vmatprep.subr.bf16.mxu1 %v1239_v0  ;;  %v483_v30 = vrot.slane %v463_v26, 1  ;;  %v496_v32 = vsel %vm495_vm6, %v494_v28, %v480_v27  ;;  %v1069_v38 = vld [vmem:[%s1521_s11 + $0x30] sm:$0xff]  }
  0x96   : > { %949 = vmatpush3.bf16.msra.mxu0 %v1059_v16  ;;  %v900_v40 = vld [vmem:[%s364_s15] ss:$0 sm:$0xff] }
  0x97   : > { %950 = vmatprep.subr.bf16.mxu0 %v1239_v0  ;;  %v498_v34 = vsel %vm497_vm7, %v496_v32, %v483_v30  ;;  %v909_v48 = vld [vmem:[%s367_s21] ss:$0 sm:$0xff] }
  0x98   : > { %965 = vmatpush3.bf16.msra.mxu1 %v1065_v25  ;;  %v499_v36 = vpack.c.bf16 %v498_v34, %v498_v34 }
  0x99   : > { %966 = vmatprep.subr.bf16.mxu1 %v1239_v0 }
  0x9a   : > { %951 = vmatpush3.bf16.msra.mxu0 %v1060_v23 }
  0x9b   : > { %952 = vmatprep.subr.bf16.mxu0 %v1239_v0 }
  0x9c   : > { %967 = vmatpush3.bf16.msra.mxu1 %v1066_v31 }
  0x9d   : > { %968 = vmatprep.subr.bf16.mxu1 %v1239_v0 }
  0x9e   : > { %953 = vmatpush3.bf16.msra.mxu0 %v1061_v29 }
  0x9f   : > { %954 = vmatprep.subr.bf16.mxu0 %v1239_v0 }
  0xa0   : > { %969 = vmatpush3.bf16.msra.mxu1 %v1067_v35 }
  0xa1   : > { %970 = vmatprep.subr.bf16.mxu1 %v1239_v0 }
  0xa2   : > { %955 = vmatpush3.bf16.msra.mxu0 %v1062_v33 }
  0xa4   : > { %971 = vmatpush3.bf16.msra.mxu1 %v1068_v37 }
  0xa5   : > { %957 = vmatmul.mubr.bf16.vlgmr.msra.gmra.mrb[0].mxu0 %v499_v36  ;;  %972 = vmatprep.subr.bf16.mxu1 %v1239_v0 }
  0xa8   : > { %973 = vmatpush3.bf16.msra.mxu1 %v1069_v38 }
  0xa9   : > { %974 = vmatprep.subr.bf16.mxu1 %v1239_v0 }
  0xac   : > { %975 = vmatpush3.bf16.msra.mxu1 %v1070_v39 }
 0x178   : > { %v605_v41 = vpop.f32.mrb[0].mxu0 }
 0x179   : > { %v606_v42 = vadd.f32 %v900_v40, %v605_v41  ;;  %v958_v43 = vpop.f32.mrb[1].mxu0 }
 0x17a   : > { %v608_v44 = vpop.f32.mrb[2].mxu0 }
 0x17b   : > { %v611_v45 = vmax.f32 %v606_v42, 0.0  ;;  %v959_v46 = vpop.f32.mrb[3].mxu0 }
 0x17d   : > { %v612_v47 = vpack.c.bf16 %v611_v45, %v611_v45 }
 0x17f   : > { %977 = vmatmul.mubr.bf16.vlgmr.msra.gmra.mrb[0].mxu1 %v612_v47 }
 0x252   : > { %v718_v49 = vpop.f32.mrb[0].mxu1 }
 0x253   : > { %v719_v50 = vadd.f32 %v909_v48, %v718_v49  ;;  %v978_v51 = vpop.f32.mrb[1].mxu1 }
 0x254   : > { %v721_v52 = vpop.f32.mrb[2].mxu1 }
 0x255   : > { %724 = vst [vmem:[%s374_s23] sm:$0xff] %v719_v50  ;;  %v979_v53 = vpop.f32.mrb[3].mxu1 }
 0x256 PF: > { %s28_s30 = sadd.s32 1, %s1229_s30   ;;  %s1605_s26 = smov %s1213_s0 }
 0x257   : > { %p25_p6 = scmp.ge.s32.totalorder %s28_s30, 4   ;;  %s1606_s0 = smov %s1217_s27 }
 0x258   : > { %s1607_s27 = smov %s1326_s12  ;;  %s1608_s28 = smov %s1225_s29 }
 0x259   : > { %s1609_s29 = smov %s1611_s8  ;;  %27 = sbr.rel (!%p25_p6) target bundleno = 22 (0x16), region = 118 }
 0x260   :  { %750 = vsyncpa [#allocation5], 1 }
 0x261   :  { %752 = vsyncpa [#allocation5 + $0x1], 1 }
 0x262   :  { %753 = vsyncpa [#allocation7], 1 }
 0x263   :  { %755 = vsyncpa [#allocation7 + $0x1], 1 }

</bundles_post_ra>
